<compile_context>
chip_gen: v7x
topology: tpu7x:2x2x1
jax: 0.10.0
libtpu: 0.0.40
codegen_flags: <defaults>
</compile_context>

<pallas_src>
import jax
import jax.numpy as jnp
from jax.experimental import pallas as pl
from jax.experimental.pallas import tpu as pltpu


def _outconv_kernel(x_ref, w_ref, b_ref, o_ref):
    # x_ref: (Cin, T)   w_ref: (Cout, Cin)   b_ref: (Cout, 1)   o_ref: (Cout, T)
    acc = jnp.dot(w_ref[...], x_ref[...], preferred_element_type=jnp.float32)
    o_ref[...] = (acc + b_ref[...]).astype(o_ref.dtype)


def _vmem_capacity_bytes():
    """Physical VMEM per TensorCore; falls back to the v7x floor (64 MiB)."""
    try:
        cap = getattr(pltpu.get_tpu_info(), "vmem_capacity_bytes", None)
        if cap:
            return int(cap)
    except Exception:
        pass
    return 64 << 20


def _pick_tile_hw(HW, Cin, Cout, itemsize, target, vmem_block_budget):
    """Largest lane-multiple tile <= target whose double-buffered blocks fit."""
    hw_lanes = pl.cdiv(HW, 128) * 128          # H*W rounded up to whole lanes
    tile = min(int(target), int(hw_lanes))
    tile = max(128, (tile // 128) * 128)

    def blocks_bytes(t):
        # double-buffered x tile + double-buffered out tile
        return 2 * (Cin + Cout) * t * itemsize

    while tile > 128 and blocks_bytes(tile) > vmem_block_budget:
        tile -= 128
    return tile


def outconv_pallas(x_nchw, weight, bias, *, tile_hw=32768,
                   vmem_block_budget=None):
    """1x1 conv, stride 1 (UNet OutConv), NCHW-native.

    x_nchw : (N, Cin, H, W)      (kept in its incoming dtype; no wrapper cast)
    weight : (Cout, Cin, 1, 1)   PyTorch Conv2d weight layout
    bias   : (Cout,)
    returns: (N, Cout, H, W)
    """
    N, Cin, H, W = x_nchw.shape
    Cout = weight.shape[0]
    HW = H * W
    itemsize = jnp.dtype(x_nchw.dtype).itemsize

    cap = _vmem_capacity_bytes()
    if vmem_block_budget is None:
        # ~65% of physical VMEM for the pipelined tiles: ~83 MiB on v5e/v6e,
        # ~44 MiB on v7x, leaving headroom for params + compiler scratch.
        vmem_block_budget = int(cap * 0.65)

    tile = _pick_tile_hw(HW, Cin, Cout, itemsize, tile_hw, vmem_block_budget)
    num_tiles = pl.cdiv(HW, tile)

    # Free, contiguous reshape; NO jnp.pad.  The ragged last block (HW % tile)
    # is masked by Pallas on store, and the matmul epilogue is purely
    # columnwise, so out-of-range x columns never contaminate valid outputs.
    x = x_nchw.reshape(N, Cin, HW)

    # Tiny resident params: weight in the activation dtype (halves its HBM
    # read for bf16 activations; numerics note: bf16 runs need looser tols
    # vs an f32 PyTorch reference), bias kept f32 for the f32 epilogue add.
    w_mat = weight.reshape(Cout, Cin).astype(x.dtype)     # (Cout, Cin)
    b_col = bias.reshape(Cout, 1).astype(jnp.float32)     # (Cout, 1)

    # Long spatial-tile axis first -> even 2-way megacore split on v7x even
    # when N is 1-2; both axes independent ("parallel").
    grid = (num_tiles, N)

    # Explicit VMEM accounting: 2 pipeline buffers per tiled array + params +
    # headroom; never request more than ~80% of this generation's VMEM.
    need = (2 * (Cin + Cout) * tile * itemsize
            + 2 * (Cout * Cin * itemsize + Cout * 4) + (2 << 20))
    vmem_limit = int(min(max(need + (8 << 20), 32 << 20), int(cap * 0.8)))

    cost = pl.CostEstimate(
        flops=2 * N * HW * Cin * Cout,
        transcendentals=0,
        bytes_accessed=(N * HW * (Cin + Cout) * itemsize
                        + Cout * Cin * itemsize + Cout * 4),
    )

    out = pl.pallas_call(
        _outconv_kernel,
        out_shape=jax.ShapeDtypeStruct((N, Cout, HW), x.dtype),
        grid_spec=pltpu.PrefetchScalarGridSpec(
            num_scalar_prefetch=0,
            grid=grid,
            in_specs=[
                # x tile: (Cin, tile) with H*W on lanes (N dim squeezed out).
                pl.BlockSpec((None, Cin, tile), lambda j, n: (n, 0, j)),
                # full weight and bias, resident every step.
                pl.BlockSpec((Cout, Cin), lambda j, n: (0, 0)),
                pl.BlockSpec((Cout, 1), lambda j, n: (0, 0)),
            ],
            # Lane-dense output block: last dim is the large H*W tile.
            out_specs=pl.BlockSpec((None, Cout, tile), lambda j, n: (n, 0, j)),
        ),
        compiler_params=pltpu.CompilerParams(
            dimension_semantics=("parallel", "parallel"),
            vmem_limit_bytes=vmem_limit),
        cost_estimate=cost,
    )(x, w_mat, b_col)

    return out.reshape(N, Cout, H, W)                     # free reshape to NCHW


def init_outconv_params(key, in_channels, out_channels, dtype=jnp.float32):
    """Deterministic Conv2d(k=1) param init (PyTorch-style uniform bounds)."""
    k_w, k_b = jax.random.split(key)
    bound = 1.0 / (in_channels ** 0.5)
    weight = jax.random.uniform(
        k_w, (out_channels, in_channels, 1, 1), dtype=dtype,
        minval=-bound, maxval=bound)
    bias = jax.random.uniform(
        k_b, (out_channels,), dtype=dtype, minval=-bound, maxval=bound)
    return weight, bias


if __name__ == "__main__":
    key = jax.random.PRNGKey(0)

    # (N, Cin, H, W, Cout, tile_hw_override)
    test_cases = [
        (2, 4, 16, 16, 3, None),   # H*W multiple of 128: single clean block
        (1, 5, 10, 12, 3, None),   # H*W = 120: block larger than array, masked
        (1, 8, 24, 20, 3, 256),    # H*W = 480, tile 256: ragged LAST block path
    ]

    for (N, Cin, H, W, Cout, thw) in test_cases:
        key, k_x, k_p = jax.random.split(key, 3)
        x = jax.random.normal(k_x, (N, Cin, H, W), dtype=jnp.float32)
        weight, bias = init_outconv_params(k_p, Cin, Cout)

        kwargs = {} if thw is None else {"tile_hw": thw}
        out = jax.block_until_ready(outconv_pallas(x, weight, bias, **kwargs))

        # Reference: plain JAX 1x1 conv semantics.
        ref = (jnp.einsum("nchw,oc->nohw", x, weight.reshape(Cout, Cin))
               + bias.reshape(1, Cout, 1, 1))
        assert out.shape == (N, Cout, H, W)
        assert jnp.allclose(out, ref, atol=1e-5, rtol=1e-5), \
            float(jnp.max(jnp.abs(out - ref)))

    print("KERNEL_OK")
</pallas_src>

<mosaic_0001>
module attributes {stable_mosaic.version = 11 : i64} {
  func.func @_outconv_kernel(%arg0: i32, %arg1: i32, %arg2: memref<1x4x256xf32, #tpu.memory_space<vmem>>, %arg3: memref<3x4xf32, #tpu.memory_space<vmem>>, %arg4: memref<3x1xf32, #tpu.memory_space<vmem>>, %arg5: memref<1x3x256xf32, #tpu.memory_space<vmem>>) attributes {dimension_semantics = [#tpu.dimension_semantics<parallel>, #tpu.dimension_semantics<parallel>], iteration_bounds = array<i64: 1, 2>, scalar_prefetch = 0 : i64, scratch_operands = 0 : i64, tpu.core_type = #tpu.core_type<tc>, window_params = [{transform_indices = @transform_0, window_bounds = array<i64: 1, 4, 256>}, {pipeline_mode = #tpu.pipeline_mode<synchronous>, transform_indices = @transform_1, window_bounds = array<i64: 3, 4>}, {pipeline_mode = #tpu.pipeline_mode<synchronous>, transform_indices = @transform_2, window_bounds = array<i64: 3, 1>}, {transform_indices = @transform_3, window_bounds = array<i64: 1, 3, 256>}]} {
    %c0 = arith.constant 0 : index
    %c0_0 = arith.constant 0 : index
    %0 = vector.load %arg3[%c0, %c0_0] : memref<3x4xf32, #tpu.memory_space<vmem>>, vector<3x4xf32>
    %c0_1 = arith.constant 0 : index
    %c0_2 = arith.constant 0 : index
    %c0_3 = arith.constant 0 : index
    %1 = vector.load %arg2[%c0_1, %c0_2, %c0_3] : memref<1x4x256xf32, #tpu.memory_space<vmem>>, vector<1x4x256xf32>
    %2 = vector.shape_cast %1 : vector<1x4x256xf32> to vector<4x256xf32>
    %cst = arith.constant dense<0.000000e+00> : vector<3x256xf32>
    %3 = tpu.matmul %0, %2, %cst {dimension_numbers = #tpu.dot_dimension_numbers<[1], [0], [0], [1], [0, 0, 1, 1], [], []>} : vector<3x4xf32>, vector<4x256xf32>, vector<3x256xf32> -> vector<3x256xf32>
    %c0_4 = arith.constant 0 : index
    %c0_5 = arith.constant 0 : index
    %4 = vector.load %arg4[%c0_4, %c0_5] : memref<3x1xf32, #tpu.memory_space<vmem>>, vector<3x1xf32>
    %5 = vector.broadcast %4 : vector<3x1xf32> to vector<3x256xf32>
    %6 = arith.addf %3, %5 : vector<3x256xf32>
    %c0_6 = arith.constant 0 : index
    %c0_7 = arith.constant 0 : index
    %c0_8 = arith.constant 0 : index
    %7 = vector.load %arg5[%c0_6, %c0_7, %c0_8] : memref<1x3x256xf32, #tpu.memory_space<vmem>>, vector<1x3x256xf32>
    %8 = vector.shape_cast %7 : vector<1x3x256xf32> to vector<3x256xf32>
    %9 = vector.shape_cast %6 : vector<3x256xf32> to vector<1x3x256xf32>
    tpu.vector_store %arg5[%c0_6, %c0_7, %c0_8], %9 {strides = array<i32>} : memref<1x3x256xf32, #tpu.memory_space<vmem>>, vector<1x3x256xf32>,
    return
  }
  func.func @transform_0(%arg0: i32, %arg1: i32) -> (i32, i32, i32) {
    %c0_i32 = arith.constant 0 : i32
    %c0_i32_0 = arith.constant 0 : i32
    return %arg1, %c0_i32, %arg0 : i32, i32, i32
  }
  func.func @transform_1(%arg0: i32, %arg1: i32) -> (i32, i32) {
    %c0_i32 = arith.constant 0 : i32
    %c0_i32_0 = arith.constant 0 : i32
    %c0_i32_1 = arith.constant 0 : i32
    return %c0_i32, %c0_i32_0 : i32, i32
  }
  func.func @transform_2(%arg0: i32, %arg1: i32) -> (i32, i32) {
    %c0_i32 = arith.constant 0 : i32
    %c0_i32_0 = arith.constant 0 : i32
    %c0_i32_1 = arith.constant 0 : i32
    return %c0_i32, %c0_i32_0 : i32, i32
  }
  func.func @transform_3(%arg0: i32, %arg1: i32) -> (i32, i32, i32) {
    %c0_i32 = arith.constant 0 : i32
    %c0_i32_0 = arith.constant 0 : i32
    return %arg1, %c0_i32, %arg0 : i32, i32, i32
  }
}

</mosaic_0001>

<bundles_post_ra>
// kernel: tpu_custom_call.1
= control target key start
LH: loop header
LB: loop body
LE: loop exit
PB: predicated region body
PF: predicated region fallthrough
CT: control target
= control target key end

     0   :  { %8 = vsyncpa [#allocation3], 0  ;;  %s720_s0 = inlined_call_operand.hbm [shape: f32[2,4,256], index: 0, kind: input, shape index: {}]   ;;  %s721_s1 = inlined_call_operand.vmem [shape: f32[3,4], index: 1, kind: input, shape index: {}]   ;;  %s722_s2 = inlined_call_operand.vmem [shape: f32[3,1], index: 2, kind: input, shape index: {}]   ;;  %s723_s3 = inlined_call_operand.vmem [shape: f32[2,3,256], index: 3, kind: output, shape index: {}]  }
   0x1   :  { %10 = vsyncpa [#allocation3 + $0x1], 0  ;;  %s589_s12 = smov 0   ;;  %s591_s13 = smov 0  }
   0x2   :  { %s593_s14 = smov 0   ;;  %s595_s15 = smov 0  }
   0x3   :  { %s597_s16 = smov 0   ;;  %s599_s17 = smov 0  }
   0x4 LB: > { %s407_s18 = sadd.s32 4294967295, %s564_s17   ;;  %s25_s19 = sadd.s32 1, %s560_s16  ;;  %s564_s17 = sphi %s599_s17, %s16_s17   ;;  %s560_s16 = sphi %s597_s16, %s733_s16   ;;  %s556_s15 = sphi %s595_s15, %s732_s15   ;;  %s552_s14 = sphi %s593_s14, %s731_s14   ;;  %s548_s13 = sphi %s591_s13, %s730_s13   ;;  %s544_s12 = sphi %s589_s12, %s729_s12  }
   0x5   : > { %p26_p0 = scmp.ge.s32.totalorder %s25_s19, 2  ;;  %s37_s20 = sadd.s32 1, %s552_s14 }
   0x6   : > { %p44_p1 = scmp.ne.s32.totalorder %s552_s14, %s548_s13  ;;  %p45_p2 = scmp.eq.s32.totalorder %s564_s17, 0 }
   0x7   : > { %s735_s19 = smov (%p26_p0, %s25_s19), 0  ;;  %p50_p4 = scmp.ne.s32.totalorder %s548_s13, %s544_s12 }
   0x8   : > { %p625_p3 = por %p45_p2, %p44_p1  ;;  %s32_s22 = ssub.s32 %s560_s16, %s735_s19 }
   0x9   : > { %p51_p5 = scmp.eq.s32.totalorder %s407_s18, 0  ;;  %p35_p6 = scmp.eq.s32.totalorder %s32_s22, 0 }
   0xa   : > { %p431_p8 = scmp.lt.s32.totalorder %s564_s17, 2  ;;  %s150_s25 = sand.u32 1, %s552_s14  }
   0xb   : > { %p632_p7 = por %p51_p5, %p50_p4  ;;  %s423_s26 = sshll.u32 %s560_s16, 7 }
   0xc   : > { %s638_s24 = scalar_select %p35_p6, %s552_s14, %s37_s20  }
   0xd   : > { %s411_s27 = sshll.u32 %s150_s25, 3  ;;  %s645_s30 = scalar_lea.hbm %s720_s0, %s423_s26 }
   0xe   : > { %s154_s4 = scalar_lea.vmem [#allocation2], %s411_s27  ;;  %p649_p9 = pnand %p431_p8, %p625_p3 }
   0xf   : > { %s164_s5 = sshll.u32 %s154_s4, 4  ;;  %s151_s7 = scalar_lea.sflag [#allocation3], %s150_s25  ;;  %s653_s5 = int_to_ptr.vmem [resolvable:$true] %s164_s5 }
  0x10   : > { %s484_s8 = scalar_lea.hbm %s645_s30, 128  ;;  %p486_p13 = pneg %p649_p9 }
  0x11   : > { %p485_p12 = scmp.ne.s32.totalorder %s645_s30, %s484_s8  ;;  %s489_s11 = scalar_lea.hbm %s720_s0, 256 }
  0x12   : > { %p490_p2 = scmp.lt.u32.totalorder %s645_s30, %s720_s0  ;;  %p491_p3 = scmp.lt.u32.totalorder %s489_s11, %s484_s8 }
  0x13   : > { %p487_p0 = pnand %p486_p13, %p485_p12  ;;  %p493_p5 = scmp.lt.u32.totalorder %s484_s8, %s645_s30 }
  0x14   : > { %p492_p4 = por %p491_p3, %p490_p2 }
  0x15   : > { %p488_p1 = pneg %p487_p0 }
  0x16   : > { %p494_p6 = por %p493_p5, %p492_p4 }
  0x18   : > { %p495_p8 = pnand %p494_p6, %p488_p1 }
  0x1a   : > { %498 = shalt.err (!%p495_p8)
}
  0x1b   : > { %s499_s20 = scalar_lea.vmem %s653_s5, 128  ;;  %s566_s21 = smov [#allocation2]  }
  0x1c   : > { %p500_p12 = scmp.ne.s32.totalorder %s653_s5, %s499_s20  ;;  %s504_s22 = sshll.u32 %s566_s21, 4  ;;  %s505_s22 = int_to_ptr.vmem [resolvable:$false] %s504_s22 }
  0x1d   : > { %s506_s25 = scalar_lea.vmem %s505_s22, 256  ;;  %p507_p11 = scmp.lt.s32.totalorder %s653_s5, %s505_s22 }
  0x1e   : > { %p502_p0 = pnand %p500_p12, %p486_p13  ;;  %p508_p2 = scmp.lt.s32.totalorder %s506_s25, %s499_s20 }
  0x20   : > { %p503_p10 = pneg %p502_p0  ;;  %p509_p3 = por %p508_p2, %p507_p11 }
  0x22   : > { %p510_p4 = pnand %p509_p3, %p503_p10 }
  0x24   : > { %513 = shalt.err (!%p510_p4)
}
  0x25   : > { %430 = dma.hbm_to_vmem [thread:$0]  (!%p649_p9), %s645_s30, 128, %s653_s5, %s151_s7  }
  0x26   : > { %p727_p1 = scmp.lt.s32.totalorder %s564_s17, 3  ;;  %p728_p5 = scmp.ge.s32.totalorder %s564_s17, 1 }
  0x28   : > { %p170_p13 = pnand %p728_p5, %p727_p1 }
  0x29   : > { %s175_s26 = sand.u32 (!%p170_p13), 1, %s548_s13  }
  0x2a   : > { %173 = sbr.rel (%p170_p13) target bundleno = 273 (0x111), region = 32  ;;  %s415_s27 = sshll.u32 (!%p170_p13), %s175_s26, 3 }
  0x2b   : > { %s176_s28 = scalar_lea.sflag (!%p170_p13), [#allocation3], %s175_s26  ;;  %s179_s29 = scalar_lea.vmem (!%p170_p13), [#allocation2], %s415_s27 }
  0x31   : > { %539 = dma.done.wait (%p632_p7), %s176_s28, 128  }
  0x32   : > { %541 = vsyncadd (%p632_p7), %s176_s28, 4294967168  ;;  %v567_v0 = vmov 0.0   ;;  %v568_v1 = vmov 0   ;;  %v218_v2 = vld [vmem:[%s179_s29] sm:$0xff]  ;;  %vm231_vm0 = vcmask 1043456   ;;  %vm227_vm1 = vcmask 31744  }
  0x33   : > { %300 = vmatprep.mubr.f32.mxu0 %v567_v0  ;;  %482 = vset.pattern.permute.xlu0 %v568_v1  ;;  %v219_v3 = vld [vmem:[%s722_s2] sm:$0x7]  ;;  %v226_v4 = vcombine.high %v218_v2, %v218_v2  ;;  %p208_p7 = scmp.lt.s32.totalorder %s556_s15, 1 }
  0x34   : > { %222 = vperm.xlu0 %482, %v219_v3   ;;  %v217_v5 = vld [vmem:[%s721_s1] sm:$0x7] }
  0x35   : > { %418 = vmatprep.subr.msk.mxu0 %vm231_vm0, %v226_v4  ;;  %s737_s15 = smov (!%p208_p7, %s556_s15), 1 }
  0x36   : > { %419 = vmatpush1.msk.msra.mxu0 %vm231_vm0, %v218_v2  ;;  %s424_s23 = sshll.u32 %s737_s15, 3 }
  0x37   : > { %420 = vmatmul.mubr.msk.f32.vlgmr.msra.gmra.mrb[0].mxu0 %vm227_vm1, %v217_v5  ;;  %s215_s9 = scalar_lea.vmem %s723_s3, %s424_s23 }
  0xb3   : > { %v223_v6 = vpop.permute.xlu0 %222 }
 0x10a   : > { %v302_v7 = vpop.f32.mrb[0].mxu0 }
 0x10b   : > { %v303_v8 = vadd.f32 %v302_v7, %v223_v6  ;;  %v304_v9 = vpop.f32.mrb[1].mxu0 }
 0x10c   : > { %v305_v10 = vadd.f32 %v304_v9, %v223_v6 }
 0x10e   : > { %v309_v11 = vcombine.low %v303_v8, %v305_v10 }
 0x110   : > { %311 = vst [vmem:[%s215_s9] sm:$0x77] %v309_v11 }
 0x111 PF: > { %s16_s17 = sadd.s32 1, %s564_s17   ;;  %s729_s12 = smov %s548_s13 }
 0x112   : > { %p13_p9 = scmp.ge.s32.totalorder %s16_s17, 4   ;;  %s730_s13 = smov %s552_s14 }
 0x113   : > { %s731_s14 = smov %s638_s24  ;;  %s732_s15 = smov %s560_s16 }
 0x114   : > { %s733_s16 = smov %s735_s19  ;;  %15 = sbr.rel (!%p13_p9) target bundleno = 4 (0x4), region = 72 }
 0x11b   :  { %342 = vsyncpa [#allocation3], 1 }
 0x11c   :  { %344 = vsyncpa [#allocation3 + $0x1], 1 }

</bundles_post_ra>
